<compile_context>
chip_gen: v5e
topology: v5e:2x2
jax: 0.10.0
libtpu: 0.0.40
codegen_flags: <defaults>
</compile_context>

<pallas_src>
import functools

import jax
import jax.numpy as jnp
from jax.experimental import pallas as pl
from jax.experimental.pallas import tpu as pltpu

_LANE = 128          # TPU lane width: vocab axis is padded up to a multiple of this.
_SUBLANE = 8
_DEFAULT_ROW_TILE = 1024   # 512-1024 sweet spot per review; sweep up to 2048 on v7x.


def _round_up(x, m):
    return (x + m - 1) // m * m


def prepare_bigram_table(table):
    """Pad the (V, V) embedding table for the kernels. Build ONCE at init.

    Layout of the returned (vpad, vpad) f32 array:
      * rows [0, V), cols [0, V): the embedding table (== per-token logits).
      * column V of rows [0, V): logsumexp(table[i, :V]) -- precomputed so the
        train kernel never runs exp/log; the one-hot matmul delivers it.
      * everything else: zeros (padded rows are never selected by idx < V and
        padded columns are sliced away by the wrapper).
    """
    V = table.shape[0]
    vpad = _round_up(V + 1, _LANE)
    t32 = table.astype(jnp.float32)
    lse = jax.nn.logsumexp(t32, axis=-1)                       # (V,)
    table_p = jnp.zeros((vpad, vpad), jnp.float32)
    table_p = table_p.at[:V, :V].set(t32)
    table_p = table_p.at[:V, V].set(lse)
    return table_p


def _infer_kernel(idx_ref, table_ref, logits_ref):
    """Logits only (targets=None path): embedding gather as one-hot MXU matmul."""
    tile = idx_ref.shape[0]
    vpad = table_ref.shape[1]
    idx = idx_ref[...]                                               # (tile, 1) i32
    classes = jax.lax.broadcasted_iota(jnp.int32, (tile, vpad), 1)   # (tile, vpad)
    onehot = (classes == idx).astype(jnp.float32)
    logits_ref[...] = jnp.dot(onehot, table_ref[...],
                              preferred_element_type=jnp.float32)


def _loss_body(idx_ref, tgt_ref, table_ref, part_ref, logits_ref, *, lse_col):
    """One row tile: (optional) logits store + per-tile partial cross-entropy.

    Per-row loss = logsumexp(table[idx]) - table[idx, tgt]. Both terms come out
    of the SAME one-hot matmul (the prepared table carries its row-LSE in
    column `lse_col`), so per-tile work is one MXU matmul + VPU compare/select
    + VPU adds.  No exp/log, no cross-lane reduction, no scalar extraction and
    no cross-step carry -> the grid axis is safe to run "parallel".
    Padded rows carry tgt == -1 and contribute exactly zero.
    """
    tile = idx_ref.shape[0]
    vpad = table_ref.shape[1]
    idx = idx_ref[...]                                               # (tile, 1) i32
    tgt = tgt_ref[...]                                               # (tile, 1) i32
    classes = jax.lax.broadcasted_iota(jnp.int32, (tile, vpad), 1)   # (tile, vpad)

    # Embedding gather as a one-hot matmul on the MXU (gather-free on TPU).
    # Default f32 matmul precision already meets 1e-5 vs a true gather; add
    # precision=HIGHEST here if bit-exactness ever matters (kernel is not
    # MXU-bound, so it would be ~free).
    onehot = (classes == idx).astype(jnp.float32)
    logits = jnp.dot(onehot, table_ref[...],
                     preferred_element_type=jnp.float32)             # (tile, vpad)
    if logits_ref is not None:
        logits_ref[...] = logits                                     # lane-dense store

    # contrib[r, tgt[r]]  = -logits[r, tgt[r]]   (= -table[idx_r, tgt_r])
    # contrib[r, lse_col] = +logits[r, lse_col]  (= +logsumexp(table[idx_r]))
    # rows with tgt == -1 (padding) contribute nothing anywhere.
    contrib = (jnp.where(classes == tgt, -logits, 0.0)
               + jnp.where((classes == lse_col) & (tgt >= 0), logits, 0.0))

    # Fold this tile's rows into one (8, vpad) lane-dense slab using pure VPU
    # adds; the (tile, vpad) -> (tile//8, 8, vpad) reshape is layout-preserving.
    part_ref[...] = jnp.sum(contrib.reshape(tile // _SUBLANE, _SUBLANE, vpad),
                            axis=0)


def _train_kernel(idx_ref, tgt_ref, table_ref, logits_ref, part_ref, *, lse_col):
    _loss_body(idx_ref, tgt_ref, table_ref, part_ref, logits_ref, lse_col=lse_col)


def _loss_only_kernel(idx_ref, tgt_ref, table_ref, part_ref, *, lse_col):
    _loss_body(idx_ref, tgt_ref, table_ref, part_ref, None, lse_col=lse_col)


def bigram_forward(idx, table, targets=None, *, table_p=None, row_tile=None,
                   return_logits=True):
    """Equivalent of BigramLanguageModel.forward(idx, targets).

    Returns (logits, loss).  Like the PyTorch module: logits are (B, T, V) when
    targets is None and (B*T, V) otherwise.  Pass table_p=prepare_bigram_table
    (table) (built once at init) to skip per-call table padding, and
    return_logits=False for training steps that only need the loss (skips the
    dominant (B*T, 128) f32 logits HBM store + the wrapper re-slice).
    """
    B, T = idx.shape
    V = table.shape[0]
    BT = B * T

    if table_p is None:
        table_p = prepare_bigram_table(table)
    vpad = table_p.shape[1]

    if row_tile is None:
        # Single tile for small inputs; ~1024 rows otherwise so each grid step
        # moves >=512 KiB of logits (well past the ~0.35us/step overhead knee).
        # On v7x this can be swept to 2048: still <2 MiB double-buffered.
        row_tile = min(_DEFAULT_ROW_TILE, _round_up(BT, _SUBLANE))
    row_tile = _round_up(row_tile, _SUBLANE)
    bt_pad = _round_up(max(BT, 1), row_tile)
    n_tiles = bt_pad // row_tile

    idx_flat = jnp.pad(idx.reshape(BT).astype(jnp.int32),
                       (0, bt_pad - BT)).reshape(bt_pad, 1)

    rows_spec = pl.BlockSpec((row_tile, 1), lambda i: (i, 0))
    table_spec = pl.BlockSpec((vpad, vpad), lambda i: (0, 0))        # resident block
    logits_shape = jax.ShapeDtypeStruct((bt_pad, vpad), jnp.float32)
    logits_spec = pl.BlockSpec((row_tile, vpad), lambda i: (i, 0))
    parallel = pltpu.CompilerParams(dimension_semantics=("parallel",))

    if targets is None:
        # Inference path: no target DMA, no cross-entropy work at all.
        logits_p = pl.pallas_call(
            _infer_kernel,
            grid=(n_tiles,),
            out_shape=logits_shape,
            in_specs=[rows_spec, table_spec],
            out_specs=logits_spec,
            compiler_params=parallel,
        )(idx_flat, table_p)
        return logits_p[:BT, :V].reshape(B, T, V), None

    # Padded rows get target = -1 so they contribute exactly zero loss.
    tgt_flat = jnp.pad(targets.reshape(BT).astype(jnp.int32),
                       (0, bt_pad - BT), constant_values=-1).reshape(bt_pad, 1)

    part_shape = jax.ShapeDtypeStruct((n_tiles * _SUBLANE, vpad), jnp.float32)
    part_spec = pl.BlockSpec((_SUBLANE, vpad), lambda i: (i, 0))

    if return_logits:
        kernel = functools.partial(_train_kernel, lse_col=V)
        logits_p, partials = pl.pallas_call(
            kernel,
            grid=(n_tiles,),
            out_shape=(logits_shape, part_shape),
            in_specs=[rows_spec, rows_spec, table_spec],
            out_specs=(logits_spec, part_spec),
            compiler_params=parallel,
        )(idx_flat, tgt_flat, table_p)
        logits = logits_p[:BT, :V]                 # (B*T, V), like the PyTorch module
    else:
        kernel = functools.partial(_loss_only_kernel, lse_col=V)
        partials = pl.pallas_call(
            kernel,
            grid=(n_tiles,),
            out_shape=part_shape,
            in_specs=[rows_spec, rows_spec, table_spec],
            out_specs=part_spec,
            compiler_params=parallel,
        )(idx_flat, tgt_flat, table_p)
        logits = None

    loss = jnp.sum(partials) * (1.0 / BT)          # tiny (n_tiles*8, 128) reduce
    return logits, loss


if __name__ == "__main__":
    vocab_size = 65   # e.g. tiny-shakespeare character vocab
    B, T = 2, 8

    key = jax.random.PRNGKey(0)
    k_table, k_idx, k_tgt = jax.random.split(key, 3)

    # nn.Embedding(vocab_size, vocab_size) default init ~ N(0, 1)
    table = jax.random.normal(k_table, (vocab_size, vocab_size), dtype=jnp.float32)
    idx = jax.random.randint(k_idx, (B, T), 0, vocab_size, dtype=jnp.int32)
    targets = jax.random.randint(k_tgt, (B, T), 0, vocab_size, dtype=jnp.int32)

    # Pure-JAX reference (embedding gather + mean cross-entropy).
    ref_logits = table[idx]                                          # (B, T, V)
    flat = ref_logits.reshape(B * T, vocab_size)
    tflat = targets.reshape(B * T)
    ref_loss = jnp.mean(jax.nn.logsumexp(flat, axis=-1)
                        - flat[jnp.arange(B * T), tflat])

    table_p = prepare_bigram_table(table)          # built once (hoisted out of the step)

    # Training path: logits + loss.
    logits, loss = bigram_forward(idx, table, targets, table_p=table_p)
    jax.block_until_ready((logits, loss))
    assert logits.shape == (B * T, vocab_size)
    assert jnp.allclose(logits, flat, atol=1e-5, rtol=1e-5)
    assert jnp.allclose(loss, ref_loss, atol=1e-5, rtol=1e-5)

    # Loss-only training path: skips the logits HBM store entirely.
    no_logits, loss_only = bigram_forward(idx, table, targets, table_p=table_p,
                                          return_logits=False)
    jax.block_until_ready(loss_only)
    assert no_logits is None
    assert jnp.allclose(loss_only, ref_loss, atol=1e-5, rtol=1e-5)

    # Multi-tile grid path (force >1 row tile on this tiny input).
    _, loss_grid = bigram_forward(idx, table, targets, table_p=table_p, row_tile=8)
    jax.block_until_ready(loss_grid)
    assert jnp.allclose(loss_grid, ref_loss, atol=1e-5, rtol=1e-5)

    # Inference path (targets=None): loss is None, logits (B, T, V).
    logits_only, none_loss = bigram_forward(idx, table, None, table_p=table_p)
    jax.block_until_ready(logits_only)
    assert none_loss is None
    assert logits_only.shape == (B, T, vocab_size)
    assert jnp.allclose(logits_only, ref_logits, atol=1e-5, rtol=1e-5)

    # TODO(synk): generate() (autoregressive torch.multinomial sampling loop) is
    # host-side control flow around forward(); it would wrap bigram_forward +
    # jax.random.categorical rather than being a kernel.
    print("KERNEL_OK")
</pallas_src>

<mosaic_0001>
module attributes {stable_mosaic.version = 11 : i64} {
  func.func @_train_kernel(%arg0: i32, %arg1: memref<16x1xi32, #tpu.memory_space<vmem>>, %arg2: memref<16x1xi32, #tpu.memory_space<vmem>>, %arg3: memref<128x128xf32, #tpu.memory_space<vmem>>, %arg4: memref<16x128xf32, #tpu.memory_space<vmem>>, %arg5: memref<8x128xf32, #tpu.memory_space<vmem>>) attributes {dimension_semantics = [#tpu.dimension_semantics<parallel>], iteration_bounds = array<i64: 1>, scalar_prefetch = 0 : i64, scratch_operands = 0 : i64, tpu.core_type = #tpu.core_type<tc>, window_params = [{transform_indices = @transform_0, window_bounds = array<i64: 16, 1>}, {transform_indices = @transform_1, window_bounds = array<i64: 16, 1>}, {pipeline_mode = #tpu.pipeline_mode<synchronous>, transform_indices = @transform_2, window_bounds = array<i64: 128, 128>}, {transform_indices = @transform_3, window_bounds = array<i64: 16, 128>}, {transform_indices = @transform_4, window_bounds = array<i64: 8, 128>}]} {
    %c0 = arith.constant 0 : index
    %c0_0 = arith.constant 0 : index
    %0 = vector.load %arg1[%c0, %c0_0] : memref<16x1xi32, #tpu.memory_space<vmem>>, vector<16x1xi32>
    %c0_1 = arith.constant 0 : index
    %c0_2 = arith.constant 0 : index
    %1 = vector.load %arg2[%c0_1, %c0_2] : memref<16x1xi32, #tpu.memory_space<vmem>>, vector<16x1xi32>
    %2 = tpu.iota {dimensions = array<i32: 1>} : vector<16x128xi32>
    %3 = vector.broadcast %0 : vector<16x1xi32> to vector<16x128xi32>
    %4 = arith.cmpi eq, %2, %3 : vector<16x128xi32>
    %5 = arith.extui %4 : vector<16x128xi1> to vector<16x128xi32>
    %6 = arith.sitofp %5 : vector<16x128xi32> to vector<16x128xf32>
    %c0_3 = arith.constant 0 : index
    %c0_4 = arith.constant 0 : index
    %7 = vector.load %arg3[%c0_3, %c0_4] : memref<128x128xf32, #tpu.memory_space<vmem>>, vector<128x128xf32>
    %cst = arith.constant dense<0.000000e+00> : vector<16x128xf32>
    %8 = tpu.matmul %6, %7, %cst {dimension_numbers = #tpu.dot_dimension_numbers<[1], [0], [0], [1], [0, 0, 1, 1], [], []>} : vector<16x128xf32>, vector<128x128xf32>, vector<16x128xf32> -> vector<16x128xf32>
    %c0_5 = arith.constant 0 : index
    %c0_6 = arith.constant 0 : index
    %9 = vector.load %arg4[%c0_5, %c0_6] : memref<16x128xf32, #tpu.memory_space<vmem>>, vector<16x128xf32>
    tpu.vector_store %arg4[%c0_5, %c0_6], %8 {strides = array<i32>} : memref<16x128xf32, #tpu.memory_space<vmem>>, vector<16x128xf32>,
    %10 = vector.broadcast %1 : vector<16x1xi32> to vector<16x128xi32>
    %11 = arith.cmpi eq, %2, %10 : vector<16x128xi32>
    %cst_7 = arith.constant 0.000000e+00 : f32
    %12 = vector.broadcast %cst_7 : f32 to vector<16x128xf32>
    %13 = arith.subf %12, %8 : vector<16x128xf32>
    %cst_8 = arith.constant 0.000000e+00 : f32
    %14 = vector.broadcast %cst_8 : f32 to vector<16x128xf32>
    %15 = arith.select %11, %13, %14 : vector<16x128xi1>, vector<16x128xf32>
    %c65_i32 = arith.constant 65 : i32
    %16 = vector.broadcast %c65_i32 : i32 to vector<16x128xi32>
    %17 = arith.cmpi eq, %2, %16 : vector<16x128xi32>
    %c0_i32 = arith.constant 0 : i32
    %18 = vector.broadcast %c0_i32 : i32 to vector<16x1xi32>
    %19 = arith.cmpi sge, %1, %18 : vector<16x1xi32>
    %20 = vector.broadcast %19 : vector<16x1xi1> to vector<16x128xi1>
    %21 = arith.andi %17, %20 : vector<16x128xi1>
    %cst_9 = arith.constant 0.000000e+00 : f32
    %22 = vector.broadcast %cst_9 : f32 to vector<16x128xf32>
    %23 = arith.select %21, %8, %22 : vector<16x128xi1>, vector<16x128xf32>
    %24 = arith.addf %15, %23 : vector<16x128xf32>
    %25 = vector.shape_cast %24 : vector<16x128xf32> to vector<2x8x128xf32>
    %cst_10 = arith.constant dense<0.000000e+00> : vector<8x128xf32>
    %26 = vector.multi_reduction <add>, %25, %cst_10 [0] : vector<2x8x128xf32> to vector<8x128xf32>
    %c0_11 = arith.constant 0 : index
    %c0_12 = arith.constant 0 : index
    %27 = vector.load %arg5[%c0_11, %c0_12] : memref<8x128xf32, #tpu.memory_space<vmem>>, vector<8x128xf32>
    tpu.vector_store %arg5[%c0_11, %c0_12], %26 {strides = array<i32>} : memref<8x128xf32, #tpu.memory_space<vmem>>, vector<8x128xf32>,
    return
  }
  func.func @transform_0(%arg0: i32) -> (i32, i32) {
    %c0_i32 = arith.constant 0 : i32
    %c0_i32_0 = arith.constant 0 : i32
    return %arg0, %c0_i32 : i32, i32
  }
  func.func @transform_1(%arg0: i32) -> (i32, i32) {
    %c0_i32 = arith.constant 0 : i32
    %c0_i32_0 = arith.constant 0 : i32
    return %arg0, %c0_i32 : i32, i32
  }
  func.func @transform_2(%arg0: i32) -> (i32, i32) {
    %c0_i32 = arith.constant 0 : i32
    %c0_i32_0 = arith.constant 0 : i32
    %c0_i32_1 = arith.constant 0 : i32
    return %c0_i32, %c0_i32_0 : i32, i32
  }
  func.func @transform_3(%arg0: i32) -> (i32, i32) {
    %c0_i32 = arith.constant 0 : i32
    %c0_i32_0 = arith.constant 0 : i32
    return %arg0, %c0_i32 : i32, i32
  }
  func.func @transform_4(%arg0: i32) -> (i32, i32) {
    %c0_i32 = arith.constant 0 : i32
    %c0_i32_0 = arith.constant 0 : i32
    return %arg0, %c0_i32 : i32, i32
  }
}

</mosaic_0001>

<bundles_post_ra>
// kernel: tpu_custom_call.1
= control target key start
LH: loop header
LB: loop body
LE: loop exit
PB: predicated region body
PF: predicated region fallthrough
CT: control target
= control target key end

     0   :  { %10 = vsyncpa [#allocation3], 0  ;;  %s333_s0 = inlined_call_operand.vmem [shape: s32[16,1], index: 0, kind: input, shape index: {}]   ;;  %s334_s1 = inlined_call_operand.vmem [shape: s32[16,1], index: 1, kind: input, shape index: {}]   ;;  %s335_s2 = inlined_call_operand.hbm [shape: f32[128,128], index: 2, kind: input, shape index: {}]   ;;  %s336_s3 = inlined_call_operand.hbm [shape: f32[16,128], index: 3, kind: output, shape index: {0}]   ;;  %s337_s4 = inlined_call_operand.hbm [shape: f32[8,128], index: 4, kind: output, shape index: {1}]  }
   0x1   :  { %11 = vsyncpa [#allocation4], 0 }
   0x2   :  { %12 = vsyncpa [#allocation7], 0  ;;  %s21_s17 = sshll.u32 %s335_s2, 4  ;;  %s269_s18 = smov [#allocation2]   ;;  %s22_s17 = int_to_ptr.hbm [resolvable:$true] %s21_s17 }
   0x3   :  { %s23_s19 = sshll.u32 %s269_s18, 4  ;;  %s270_s20 = smov 128   ;;  %s24_s19 = int_to_ptr.vmem [resolvable:$true] %s23_s19 }
   0x4   :  { %s271_s21 = smov 8  }
   0x5   :  { %29 = dma.hbm_to_vmem [thread:$0]  %s22_s17, 2048, %s24_s19, [#allocation3], %s270_s20, %s270_s20, %s271_s21  }
   0x6   :  { %263 = dma.done.wait [#allocation3], 2048  }
   0x7   :  { %264 = vsyncadd [#allocation3], 4294965248  ;;  %v272_v0 = vmov 0   ;;  %v34_v1 = vld [vmem:[%s333_s0] sm:$0xff]  ;;  %v67_v2 = vld [vmem:[#allocation2 + $0x78] sm:$0xff]  ;;  %v38_v23 = vlaneseq  ;;  %v273_v26 = vmov 1.0  }
   0x8   :  { %188 = vset.pattern.permute.xlu0 %v272_v0  ;;  %189 = vset.pattern.permute.xlu1 %v272_v0  ;;  %v66_v3 = vld [vmem:[#allocation2 + $0x70] sm:$0xff]  ;;  %v65_v4 = vld [vmem:[#allocation2 + $0x68] sm:$0xff]  ;;  %v64_v5 = vld [vmem:[#allocation2 + $0x60] sm:$0xff]  ;;  %s132_s5 = sshll.u32 %s336_s3, 4  ;;  %s275_s3 = smov [#allocation6]   ;;  %s133_s5 = int_to_ptr.hbm [resolvable:$true] %s132_s5 }
   0x9   :  { %190 = vset.pattern.permute.xlu2 %v272_v0  ;;  %41 = vperm.xlu0 %188, %v34_v1   ;;  %v35_v6 = vld [vmem:[%s333_s0 + $0x8] sm:$0xff]  ;;  %v63_v7 = vld [vmem:[#allocation2 + $0x58] sm:$0xff]  ;;  %v62_v8 = vld [vmem:[#allocation2 + $0x50] sm:$0xff]  ;;  %v39_v24 = vand.u32 127, %v38_v23  ;;  %s144_s6 = sshll.u32 %s275_s3, 4  ;;  %s146_s9 = sshll.u32 %s337_s4, 4  ;;  %s145_s6 = int_to_ptr.vmem [resolvable:$true] %s144_s6  ;;  %s147_s9 = int_to_ptr.hbm [resolvable:$true] %s146_s9 }
   0xa   :  { %68 = vmatpush.msra.mxu0 %v67_v2  ;;  %165 = vmatpush.msra.mxu1 %v67_v2  ;;  %v61_v9 = vld [vmem:[#allocation2 + $0x48] sm:$0xff]  ;;  %v60_v10 = vld [vmem:[#allocation2 + $0x40] sm:$0xff]  ;;  %v59_v11 = vld [vmem:[#allocation2 + $0x38] sm:$0xff] }
   0xb   :  { %v58_v12 = vld [vmem:[#allocation2 + $0x30] sm:$0xff]  ;;  %v57_v13 = vld [vmem:[#allocation2 + $0x28] sm:$0xff]  ;;  %v56_v14 = vld [vmem:[#allocation2 + $0x20] sm:$0xff]  ;;  %vm105_vm4 = vcmp.eq.s32.totalorder %v39_v24, 65 }
   0xc   :  { %69 = vmatpush.msra.mxu0 %v66_v3  ;;  %166 = vmatpush.msra.mxu1 %v66_v3  ;;  %v55_v15 = vld [vmem:[#allocation2 + $0x18] sm:$0xff]  ;;  %v54_v16 = vld [vmem:[#allocation2 + $0x10] sm:$0xff]  ;;  %v53_v17 = vld [vmem:[#allocation2 + $0x8] sm:$0xff] }
   0xd   :  { %v52_v18 = vld [vmem:[#allocation2] sm:$0xff]  ;;  %v37_v21 = vld [vmem:[%s334_s1 + $0x8] sm:$0xff] }
   0xe   :  { %70 = vmatpush.msra.mxu0 %v65_v4  ;;  %167 = vmatpush.msra.mxu1 %v65_v4  ;;  %v36_v19 = vld [vmem:[%s334_s1] sm:$0xff]  ;;  %vm107_vm1 = vcmp.ge.s32.totalorder %v37_v21, 0  ;;  %s274_s1 = smov [#allocation5]  }
   0xf   :  { %vm106_vm0 = vcmp.ge.s32.totalorder %v36_v19, 0  ;;  %94 = vperm.xlu2 %190, %v36_v19   ;;  %v109_v22 = vsel %vm107_vm1, 1, %v272_v0  ;;  %s130_s28 = sshll.u32 %s274_s1, 4  ;;  %s131_s28 = int_to_ptr.vmem [resolvable:$true] %s130_s28 }
  0x10   :  { %71 = vmatpush.msra.mxu0 %v64_v5  ;;  %168 = vmatpush.msra.mxu1 %v64_v5  ;;  %v108_v20 = vsel %vm106_vm0, 1, %v272_v0 }
  0x11   :  { %44 = vperm.xlu0 %188, %v35_v6   ;;  %111 = vperm.xlu1 %189, %v108_v20  }
  0x12   :  { %72 = vmatpush.msra.mxu0 %v63_v7  ;;  %169 = vmatpush.msra.mxu1 %v63_v7 }
  0x14   :  { %73 = vmatpush.msra.mxu0 %v62_v8  ;;  %170 = vmatpush.msra.mxu1 %v62_v8 }
  0x16   :  { %74 = vmatpush.msra.mxu0 %v61_v9  ;;  %171 = vmatpush.msra.mxu1 %v61_v9 }
  0x17   :  { %97 = vperm.xlu2 %190, %v37_v21  }
  0x18   :  { %75 = vmatpush.msra.mxu0 %v60_v10  ;;  %172 = vmatpush.msra.mxu1 %v60_v10 }
  0x19   :  { %114 = vperm.xlu1 %189, %v109_v22  }
  0x1a   :  { %76 = vmatpush.msra.mxu0 %v59_v11  ;;  %173 = vmatpush.msra.mxu1 %v59_v11 }
  0x1c   :  { %77 = vmatpush.msra.mxu0 %v58_v12  ;;  %174 = vmatpush.msra.mxu1 %v58_v12 }
  0x1e   :  { %78 = vmatpush.msra.mxu0 %v57_v13  ;;  %175 = vmatpush.msra.mxu1 %v57_v13 }
  0x20   :  { %79 = vmatpush.msra.mxu0 %v56_v14  ;;  %176 = vmatpush.msra.mxu1 %v56_v14 }
  0x22   :  { %80 = vmatpush.msra.mxu0 %v55_v15  ;;  %177 = vmatpush.msra.mxu1 %v55_v15 }
  0x24   :  { %81 = vmatpush.msra.mxu0 %v54_v16  ;;  %178 = vmatpush.msra.mxu1 %v54_v16 }
  0x26   :  { %82 = vmatpush.msra.mxu0 %v53_v17  ;;  %179 = vmatpush.msra.mxu1 %v53_v17 }
  0x28   :  { %83 = vmatpush.msra.mxu0 %v52_v18  ;;  %180 = vmatpush.msra.mxu1 %v52_v18 }
  0x69   :  { %v95_v29 = vpop.permute.xlu2 %94 }
  0x6a   :  { %vm99_vm6 = vcmp.eq.s32.totalorder %v39_v24, %v95_v29 }
  0x71   :  { %v98_v33 = vpop.permute.xlu2 %97 }
  0x72   :  { %vm100_vm10 = vcmp.eq.s32.totalorder %v39_v24, %v98_v33 }
  0x7b   :  { %v42_v25 = vpop.permute.xlu0 %41 }
  0x7c   :  { %vm46_vm2 = vcmp.eq.s32.totalorder %v39_v24, %v42_v25 }
  0x7d   :  { %163 = vmatmul.msk.f32.vlgmr.msra.gmra.mxu0 %vm46_vm2, %v273_v26 }
  0x83   :  { %v45_v27 = vpop.permute.xlu0 %44  ;;  %v112_v28 = vpop.permute.xlu1 %111 }
  0x84   :  { %vm47_vm3 = vcmp.eq.s32.totalorder %v39_v24, %v45_v27  ;;  %vm116_vm5 = vcmp.eq.s32.totalorder %v112_v28, 1 }
  0x85   :  { %164 = vmatmul.msk.f32.vlgmr.msra.gmra.mxu1 %vm47_vm3, %v273_v26  ;;  %vm118_vm8 = vmand %vm105_vm4, %vm116_vm5 }
  0x8b   :  { %v115_v31 = vpop.permute.xlu1 %114 }
  0x8c   :  { %vm117_vm7 = vcmp.eq.s32.totalorder %v115_v31, 1 }
  0x8d   :  { %vm119_vm9 = vmand %vm105_vm4, %vm117_vm7 }
  0xfa   :  { %v85_v30 = vpop.f32.mrf.mxu0 }
  0xfb   :  { %91 = vst [vmem:[#allocation5] sm:$0xff] %v85_v30  ;;  %v101_v32 = vsub.f32 0.0, %v85_v30  ;;  %v120_v37 = vsel %vm118_vm8, %v85_v30, 0.0 }
  0xfd   :  { %v103_v35 = vsel %vm99_vm6, %v101_v32, 0.0 }
  0xfe   :  { %v122_v40 = vadd.f32 %v120_v37, %v103_v35 }
 0x102   :  { %v88_v34 = vpop.f32.mrf.mxu1 }
 0x103   :  { %92 = vst [vmem:[#allocation5 + $0x8] sm:$0xff] %v88_v34  ;;  %v102_v36 = vsub.f32 0.0, %v88_v34  ;;  %v121_v39 = vsel %vm119_vm9, %v88_v34, 0.0 }
 0x104   :  { %138 = dma.vmem_to_hbm [thread:$0]  %s131_s28, 256, %s133_s5, [#allocation4], %s270_s20, %s270_s20, %s271_s21  }
 0x105   :  { %v104_v38 = vsel %vm100_vm10, %v102_v36, 0.0 }
 0x106   :  { %v123_v41 = vadd.f32 %v121_v39, %v104_v38 }
 0x108   :  { %v124_v42 = vadd.f32 %v123_v41, %v122_v40 }
 0x10a   :  { %125 = vst [vmem:[#allocation6] sm:$0xff] %v124_v42 }
 0x10b   :  { %149 = dma.vmem_to_hbm [thread:$0]  %s145_s6, 128, %s147_s9, [#allocation7]  }
 0x10c   :  { %265 = dma.done.wait [#allocation4], 256  }
 0x10d   :  { %266 = vsyncadd [#allocation4], 4294967040 }
 0x10e   :  { %267 = dma.done.wait [#allocation7], 128  }
 0x10f   :  { %268 = vsyncadd [#allocation7], 4294967168 }
 0x110   :  { %158 = vsyncpa [#allocation3], 1 }
 0x111   :  { %159 = vsyncpa [#allocation4], 1 }
 0x112   :  { %160 = vsyncpa [#allocation7], 1 }

</bundles_post_ra>
